<compile_context>
chip_gen: v7x
topology: tpu7x:2x2x1
jax: 0.10.0
libtpu: 0.0.40
codegen_flags: <defaults>
</compile_context>

<pallas_src>
import functools

import jax
import jax.numpy as jnp
from jax.experimental import pallas as pl
from jax.experimental.pallas import tpu as pltpu


def _round_up(x: int, m: int) -> int:
    return ((x + m - 1) // m) * m


# ----------------------------- kernels ---------------------------------------


def _mm_relu_bias_kernel(x_ref, w_ref, b_ref, o_ref, *, compute_dtype):
    # x_ref: (tile, in_cols) f32 (cast in-kernel); w_ref: (in_cols, out_cols)
    # compute dtype, resident; b_ref: (1, out_cols) f32, resident.
    x = x_ref[...].astype(compute_dtype)
    y = jnp.dot(x, w_ref[...], preferred_element_type=jnp.float32)
    y = y + b_ref[...]                       # f32 epilogue (safe on v5e VPU)
    o_ref[...] = jnp.maximum(y, 0.0).astype(o_ref.dtype)


def _mm_relu_kernel(x_ref, w_ref, o_ref, *, compute_dtype):
    x = x_ref[...].astype(compute_dtype)
    y = jnp.dot(x, w_ref[...], preferred_element_type=jnp.float32)
    o_ref[...] = jnp.maximum(y, 0.0).astype(o_ref.dtype)


# ----------------------------- parameter prep --------------------------------


def prepare_params(weight, bias=None, compute_dtype=jnp.bfloat16):
    """One-time parameter prep (hoisted out of the per-call path).

    weight: [d_model, in_features] (torch nn.Linear layout).
    bias:   [d_model] or None (module zero-inits it; None drops the operand).
    Returns a dict with plain and lane-dense ("fold") variants of the params.
    """
    w_t = jnp.asarray(weight).T.astype(compute_dtype)          # (in_features, d_model)
    in_features, d_model = w_t.shape
    b2 = None
    if bias is not None:
        b2 = jnp.asarray(bias).reshape(1, d_model).astype(jnp.float32)

    # Lane-dense fold: pack `fold` logical rows per MXU row so the output block
    # is a dense 128-lane store instead of d_model-of-128 masked stores.
    fold = 1
    if d_model < 128 and 128 % d_model == 0:
        fold = 128 // d_model

    if fold > 1:
        w_fold = jax.scipy.linalg.block_diag(*([w_t] * fold)).astype(compute_dtype)
        b_fold = jnp.tile(b2, (1, fold)) if b2 is not None else None
    else:
        w_fold, b_fold = w_t, b2

    return {"w": w_t, "b": b2, "w_fold": w_fold, "b_fold": b_fold, "fold": fold}


# ----------------------------- forward ----------------------------------------


def segment_encoder_forward(src, params, *, tile_n_max=16384,
                            out_dtype=jnp.float32, min_rows_for_pallas=2048):
    """src: [N, steps, voices*3] float32; params from prepare_params().
    Returns [N, d_model] in out_dtype (default float32, matching the module)."""
    n = src.shape[0]
    x = src.reshape(n, -1)                       # free reshape, dtype untouched
    in_features, d_model = params["w"].shape
    assert x.shape[1] == in_features, (x.shape, in_features)
    compute_dtype = params["w"].dtype

    # Tiny-batch fallback: Pallas launch / per-step overhead dwarfs ~6 Kflop/row.
    if n < min_rows_for_pallas:
        y = jnp.dot(x.astype(compute_dtype), params["w"],
                    preferred_element_type=jnp.float32)
        if params["b"] is not None:
            y = y + params["b"]
        return jnp.maximum(y, 0.0).astype(out_dtype)

    # Lane-dense layout when the fold divides the batch; otherwise plain layout.
    fold = params["fold"]
    if fold > 1 and n % fold == 0:
        rows = n // fold
        x_k = x.reshape(rows, in_features * fold)   # free, contiguous
        w_k, b_k = params["w_fold"], params["b_fold"]
    else:
        rows = n
        x_k = x
        w_k, b_k = params["w"], params["b"]
    in_cols, out_cols = w_k.shape

    # --- tile selection from a padding-aware VMEM budget ---
    x_item = jnp.dtype(x_k.dtype).itemsize          # f32 input (cast in-kernel)
    out_item = jnp.dtype(out_dtype).itemsize
    w_item = jnp.dtype(w_k.dtype).itemsize
    # In the fold path in_cols/out_cols are multiples of 128 -> no lane padding;
    # in the plain path lane-pad to 128 for the VMEM estimate.
    in_cols_pad = in_cols if in_cols % 128 == 0 else _round_up(in_cols, 128)
    out_cols_pad = out_cols if out_cols % 128 == 0 else _round_up(out_cols, 128)
    per_row = in_cols_pad * x_item + out_cols_pad * out_item
    resident = 2 * (in_cols_pad * out_cols_pad * w_item + out_cols_pad * 4)

    try:
        vmem_cap = int(pltpu.get_tpu_info().vmem_capacity_bytes)
    except Exception:
        vmem_cap = 64 * 1024 * 1024              # conservative (v7x per-TC)
    vmem_budget = int(0.75 * vmem_cap)           # ~48 MiB on v7x, ~96 MiB on v5e/v6e

    if rows < 8:
        tile = rows                               # single partial block, full-dim rule
    else:
        max_tile_vmem = max(8, ((vmem_budget - resident - (2 << 20))
                                // (2 * per_row)) // 8 * 8)
        # >= ~4 grid steps so both v7x TensorCores get work (neutral on v5e/v6e).
        four_step_tile = _round_up(pl.cdiv(rows, 4), 8)
        tile = max(8, min(tile_n_max, max_tile_vmem, four_step_tile))

    num_tiles = pl.cdiv(rows, tile)
    vmem_limit = min(vmem_budget,
                     max(32 << 20, 2 * tile * per_row + resident + (4 << 20)))

    if b_k is not None:
        kernel = functools.partial(_mm_relu_bias_kernel, compute_dtype=compute_dtype)
        in_specs = [
            pl.BlockSpec((tile, in_cols), lambda i: (i, 0)),      # x: row-tiled
            pl.BlockSpec((in_cols, out_cols), lambda i: (0, 0)),  # W: resident
            pl.BlockSpec((1, out_cols), lambda i: (0, 0)),        # b: resident
        ]
        args = (x_k, w_k, b_k)
    else:
        kernel = functools.partial(_mm_relu_kernel, compute_dtype=compute_dtype)
        in_specs = [
            pl.BlockSpec((tile, in_cols), lambda i: (i, 0)),
            pl.BlockSpec((in_cols, out_cols), lambda i: (0, 0)),
        ]
        args = (x_k, w_k)

    out = pl.pallas_call(
        kernel,
        out_shape=jax.ShapeDtypeStruct((rows, out_cols), out_dtype),
        grid=(num_tiles,),
        in_specs=in_specs,
        out_specs=pl.BlockSpec((tile, out_cols), lambda i: (i, 0)),
        compiler_params=pltpu.CompilerParams(
            dimension_semantics=("parallel",),   # shard row-tiles across TCs on v7x
            vmem_limit_bytes=int(vmem_limit),
        ),
    )(*args)

    # Fold path: (rows, d_model*fold) -> (n, d_model); plain path: no-op reshape.
    return out.reshape(n, d_model)


# ----------------------------- demo / self-test -------------------------------

if __name__ == "__main__":
    # Config consistent with the module's __init__:
    n_features_per_step = 3
    n_src1_voices, n_src2_voices = 1, 1
    n_src_voices = n_src1_voices + n_src2_voices
    steps = 16
    d_model = 32
    in_features = steps * n_src_voices * n_features_per_step   # 16 * 2 * 3 = 96

    key = jax.random.PRNGKey(0)
    k_w, k_a, k_b, k_c = jax.random.split(key, 4)

    # Parameter init mirroring the module: weight ~ U(-0.1, 0.1), bias = 0.
    weight = jax.random.uniform(k_w, (d_model, in_features), jnp.float32,
                                minval=-0.1, maxval=0.1)
    bias = jnp.zeros((d_model,), jnp.float32)

    def ref_forward(s):
        return jnp.maximum(s.reshape(s.shape[0], -1) @ weight.T + bias, 0.0)

    feat = n_src_voices * n_features_per_step

    # 1) exact f32, lane-dense fold path (batch % 4 == 0), ragged grid, Pallas forced.
    p_f32 = prepare_params(weight, bias, compute_dtype=jnp.float32)
    src1 = jax.random.normal(k_a, (40, steps, feat), jnp.float32)
    out1 = jax.block_until_ready(
        segment_encoder_forward(src1, p_f32, min_rows_for_pallas=0))
    assert out1.shape == (40, d_model)
    assert jnp.allclose(out1, ref_forward(src1), atol=1e-5, rtol=1e-5)

    # 2) exact f32, plain path (batch % 4 != 0 -> no fold), ragged grid, Pallas forced.
    src2 = jax.random.normal(k_b, (10, steps, feat), jnp.float32)
    out2 = jax.block_until_ready(
        segment_encoder_forward(src2, p_f32, min_rows_for_pallas=0))
    assert out2.shape == (10, d_model)
    assert jnp.allclose(out2, ref_forward(src2), atol=1e-5, rtol=1e-5)

    # 3) larger batch: bf16 weights + in-kernel bf16 cast of f32 activations,
    #    no bias operand (module zero-inits bias), multi-step ragged grid.
    p_bf16 = prepare_params(weight, bias=None, compute_dtype=jnp.bfloat16)
    src3 = jax.random.normal(k_c, (4100, steps, feat), jnp.float32)
    out3 = jax.block_until_ready(
        segment_encoder_forward(src3, p_bf16, min_rows_for_pallas=0))
    assert out3.shape == (4100, d_model)
    assert jnp.allclose(out3, ref_forward(src3), atol=3e-2, rtol=3e-2)

    # 4) tiny batch -> XLA fallback (Pallas launch overhead not worth a few rows).
    src4 = src2[:3]
    out4 = jax.block_until_ready(segment_encoder_forward(src4, p_bf16))
    assert jnp.allclose(out4, ref_forward(src4), atol=3e-2, rtol=3e-2)

    print("KERNEL_OK")
</pallas_src>

<mosaic_0001>
module attributes {stable_mosaic.version = 11 : i64} {
  func.func @_mm_relu_bias_kernel(%arg0: i32, %arg1: memref<8x384xf32, #tpu.memory_space<vmem>>, %arg2: memref<384x128xf32, #tpu.memory_space<vmem>>, %arg3: memref<1x128xf32, #tpu.memory_space<vmem>>, %arg4: memref<8x128xf32, #tpu.memory_space<vmem>>) attributes {dimension_semantics = [#tpu.dimension_semantics<parallel>], iteration_bounds = array<i64: 2>, scalar_prefetch = 0 : i64, scratch_operands = 0 : i64, tpu.core_type = #tpu.core_type<tc>, window_params = [{transform_indices = @transform_0, window_bounds = array<i64: 8, 384>}, {pipeline_mode = #tpu.pipeline_mode<synchronous>, transform_indices = @transform_1, window_bounds = array<i64: 384, 128>}, {pipeline_mode = #tpu.pipeline_mode<synchronous>, transform_indices = @transform_2, window_bounds = array<i64: 1, 128>}, {transform_indices = @transform_3, window_bounds = array<i64: 8, 128>}]} {
    %c0 = arith.constant 0 : index
    %c0_0 = arith.constant 0 : index
    %0 = vector.load %arg1[%c0, %c0_0] : memref<8x384xf32, #tpu.memory_space<vmem>>, vector<8x384xf32>
    %c0_1 = arith.constant 0 : index
    %c0_2 = arith.constant 0 : index
    %1 = vector.load %arg2[%c0_1, %c0_2] : memref<384x128xf32, #tpu.memory_space<vmem>>, vector<384x128xf32>
    %cst = arith.constant dense<0.000000e+00> : vector<8x128xf32>
    %2 = tpu.matmul %0, %1, %cst {dimension_numbers = #tpu.dot_dimension_numbers<[1], [0], [0], [1], [0, 0, 1, 1], [], []>} : vector<8x384xf32>, vector<384x128xf32>, vector<8x128xf32> -> vector<8x128xf32>
    %c0_3 = arith.constant 0 : index
    %c0_4 = arith.constant 0 : index
    %3 = vector.load %arg3[%c0_3, %c0_4] : memref<1x128xf32, #tpu.memory_space<vmem>>, vector<1x128xf32>
    %4 = vector.broadcast %3 : vector<1x128xf32> to vector<8x128xf32>
    %5 = arith.addf %2, %4 : vector<8x128xf32>
    %cst_5 = arith.constant 0.000000e+00 : f32
    %6 = vector.broadcast %cst_5 : f32 to vector<8x128xf32>
    %7 = arith.maximumf %5, %6 : vector<8x128xf32>
    %c0_6 = arith.constant 0 : index
    %c0_7 = arith.constant 0 : index
    %8 = vector.load %arg4[%c0_6, %c0_7] : memref<8x128xf32, #tpu.memory_space<vmem>>, vector<8x128xf32>
    tpu.vector_store %arg4[%c0_6, %c0_7], %7 {strides = array<i32>} : memref<8x128xf32, #tpu.memory_space<vmem>>, vector<8x128xf32>,
    return
  }
  func.func @transform_0(%arg0: i32) -> (i32, i32) {
    %c0_i32 = arith.constant 0 : i32
    %c0_i32_0 = arith.constant 0 : i32
    return %arg0, %c0_i32 : i32, i32
  }
  func.func @transform_1(%arg0: i32) -> (i32, i32) {
    %c0_i32 = arith.constant 0 : i32
    %c0_i32_0 = arith.constant 0 : i32
    %c0_i32_1 = arith.constant 0 : i32
    return %c0_i32, %c0_i32_0 : i32, i32
  }
  func.func @transform_2(%arg0: i32) -> (i32, i32) {
    %c0_i32 = arith.constant 0 : i32
    %c0_i32_0 = arith.constant 0 : i32
    %c0_i32_1 = arith.constant 0 : i32
    return %c0_i32, %c0_i32_0 : i32, i32
  }
  func.func @transform_3(%arg0: i32) -> (i32, i32) {
    %c0_i32 = arith.constant 0 : i32
    %c0_i32_0 = arith.constant 0 : i32
    return %arg0, %c0_i32 : i32, i32
  }
}

</mosaic_0001>

<bundles_post_ra>
// kernel: tpu_custom_call.1
= control target key start
LH: loop header
LB: loop body
LE: loop exit
PB: predicated region body
PF: predicated region fallthrough
CT: control target
= control target key end

     0   :  { %8 = vsyncpa [#allocation3], 0  ;;  %s1088_s0 = inlined_call_operand.hbm [shape: f32[10,384], index: 0, kind: input, shape index: {}]   ;;  %s1089_s1 = inlined_call_operand.hbm [shape: f32[384,128], index: 1, kind: input, shape index: {}]   ;;  %s1090_s2 = inlined_call_operand.vmem [shape: f32[1,128], index: 2, kind: input, shape index: {}]   ;;  %s1091_s3 = inlined_call_operand.hbm [shape: f32[10,128], index: 3, kind: output, shape index: {}]  }
   0x1   :  { %10 = vsyncpa [#allocation3 + $0x1], 0 }
   0x2   :  { %11 = vsyncpa [#allocation6], 0 }
   0x3   :  { %12 = vsyncpa [#allocation4], 0 }
   0x4   :  { %14 = vsyncpa [#allocation4 + $0x1], 0  ;;  %s875_s12 = smov 0   ;;  %s877_s13 = smov 0  }
   0x5   :  { %s879_s14 = smov 0   ;;  %s881_s15 = smov 0  }
   0x6 LB: > { %s896_s16 = sadd.s32 4294967295, %s845_s15   ;;  %s496_s17 = sadd.s32 4294967294, %s845_s15   ;;  %s845_s15 = sphi %s881_s15, %s1111_s15   ;;  %s841_s14 = sphi %s879_s14, %s1110_s14   ;;  %s837_s13 = sphi %s877_s13, %s1109_s13   ;;  %s833_s12 = sphi %s875_s12, %s1108_s12  }
   0x7   : > { %p40_p0 = scmp.ne.s32.totalorder %s837_s13, %s833_s12  ;;  %p1092_p1 = scmp.eq.s32.totalorder %s896_s16, 0 }
   0x8   : > { %p112_p3 = scmp.eq.s32.totalorder %s496_s17, 1  ;;  %p497_p5 = scmp.ge.s32.totalorder %s845_s15, 1 }
   0x9   : > { %p905_p4 = por %p1092_p1, %p40_p0  ;;  %p119_p7 = scmp.lt.s32.totalorder %s845_s15, 3 }
   0xa   : > { %p910_p6 = por %p112_p3, %p40_p0  ;;  %s847_s21 = smov [#allocation5]  }
   0xb   : > { %s1095_s18 = scalar_select %p905_p4, 1, 0 }
   0xc   : > { %s1096_s19 = scalar_select %p910_p6, 1, 0 }
   0xd   : > { %p915_p8 = pnand %p497_p5, %p119_p7  ;;  %s131_s22 = sshll.u32 %s847_s21, 4  ;;  %s919_s22 = int_to_ptr.vmem [resolvable:$true] %s131_s22 }
   0xe   : > { %s931_s24 = sadd.s32 1, %s845_s15   ;;  %s27_s25 = sadd.s32 1, %s841_s14 }
   0xf   : > { %s1097_s20 = scalar_select %p915_p8, 1, 0 }
  0x10   : > { %p663_p9 = pneg %p915_p8  ;;  %s24_s26 = ssub.s32 %s845_s15, %s931_s24 }
  0x11   : > { %s717_s29 = scalar_lea.hbm %s1089_s1, 6144 }
  0x12   : > { %p926_p11 = pnand %p663_p9, %p1092_p1  ;;  %p718_p12 = scmp.ne.s32.totalorder %s1089_s1, %s717_s29 }
  0x13   : > { %p724_p5 = scmp.lt.u32.totalorder %s717_s29, %s1089_s1 }
  0x14   : > { %p719_p13 = pneg %p926_p11 }
  0x16   : > { %p720_p0 = pnand %p719_p13, %p718_p12 }
  0x18   : > { %p721_p3 = pneg %p720_p0 }
  0x1a   : > { %p726_p7 = pnand %p724_p5, %p721_p3 }
  0x1c   : > { %729 = shalt.err (!%p726_p7)
}
  0x1d   : > { %s730_s7 = scalar_lea.vmem %s919_s22, 6144  ;;  %p738_p2 = scmp.lt.s32.totalorder %s919_s22, %s919_s22 }
  0x1e   : > { %p731_p9 = scmp.ne.s32.totalorder %s919_s22, %s730_s7  ;;  %p739_p6 = scmp.lt.s32.totalorder %s730_s7, %s730_s7 }
  0x20   : > { %p733_p10 = pnand %p731_p9, %p719_p13  ;;  %p740_p4 = por %p739_p6, %p738_p2 }
  0x22   : > { %p734_p1 = pneg %p733_p10 }
  0x24   : > { %p741_p8 = pnand %p740_p4, %p734_p1 }
  0x26   : > { %744 = shalt.err (!%p741_p8)
}
  0x27   : > { %s848_s8 = smov 128   ;;  %s849_s9 = smov 8  }
  0x28   : > { %666 = dma.hbm_to_vmem [thread:$0]  (!%p926_p11), %s1089_s1, 6144, %s919_s22, [#allocation6], %s848_s8, %s848_s8, %s849_s9  }
  0x29   : > { %p25_p2 = scmp.eq.s32.totalorder %s24_s26, 0  ;;  %p34_p1 = scmp.ne.s32.totalorder %s841_s14, %s837_s13 }
  0x2a   : > { %p35_p4 = scmp.eq.s32.totalorder %s845_s15, 0  ;;  %p676_p6 = scmp.lt.s32.totalorder %s845_s15, 2 }
  0x2b   : > { %s962_s17 = scalar_select %p25_p2, %s841_s14, %s27_s25  }
  0x2c   : > { %p36_p8 = por %p35_p4, %p34_p1  ;;  %p1099_p10 = scmp.eq.s32.totalorder %s896_s16, 1 }
  0x2d   : > { %s148_s27 = sand.u32 1, %s841_s14   ;;  %s653_s28 = smul.u32 384, %s845_s15 }
  0x2e   : > { %p966_p12 = por %p1099_p10, %p34_p1  ;;  %s652_s29 = smul.u32 24, %s148_s27 }
  0x2f   : > { %p972_p13 = pnand %p676_p6, %p36_p8  ;;  %s979_s25 = scalar_lea.hbm %s1088_s0, %s653_s28 }
  0x30   : > { %s152_s30 = scalar_lea.vmem [#allocation2], %s652_s29  ;;  %s149_s5 = scalar_lea.sflag [#allocation3], %s148_s27 }
  0x31   : > { %s160_s4 = sshll.u32 %s152_s30, 4  ;;  %s745_s6 = scalar_lea.hbm %s979_s25, 384  ;;  %s981_s4 = int_to_ptr.vmem [resolvable:$true] %s160_s4 }
  0x32   : > { %p746_p11 = scmp.ne.s32.totalorder %s979_s25, %s745_s6  ;;  %p747_p0 = pneg %p972_p13 }
  0x33   : > { %s750_s9 = scalar_lea.hbm %s1088_s0, 768  ;;  %p751_p7 = scmp.lt.u32.totalorder %s979_s25, %s1088_s0 }
  0x34   : > { %p748_p3 = pnand %p747_p0, %p746_p11  ;;  %p752_p9 = scmp.lt.u32.totalorder %s750_s9, %s745_s6 }
  0x35   : > { %p754_p1 = scmp.lt.u32.totalorder %s745_s6, %s979_s25 }
  0x36   : > { %p749_p5 = pneg %p748_p3  ;;  %p753_p2 = por %p752_p9, %p751_p7 }
  0x38   : > { %p755_p4 = por %p754_p1, %p753_p2 }
  0x3a   : > { %p756_p6 = pnand %p755_p4, %p749_p5 }
  0x3c   : > { %759 = shalt.err (!%p756_p6)
}
  0x3d   : > { %s760_s27 = scalar_lea.vmem %s981_s4, 384  ;;  %s850_s28 = smov [#allocation2]  }
  0x3e   : > { %p761_p8 = scmp.ne.s32.totalorder %s981_s4, %s760_s27  ;;  %s765_s29 = sshll.u32 %s850_s28, 4  ;;  %s766_s29 = int_to_ptr.vmem [resolvable:$false] %s765_s29 }
  0x3f   : > { %s767_s22 = scalar_lea.vmem %s766_s29, 768  ;;  %p768_p3 = scmp.lt.s32.totalorder %s981_s4, %s766_s29 }
  0x40   : > { %p763_p10 = pnand %p761_p8, %p747_p0  ;;  %p769_p7 = scmp.lt.s32.totalorder %s767_s22, %s760_s27 }
  0x42   : > { %p764_p11 = pneg %p763_p10  ;;  %p770_p9 = por %p769_p7, %p768_p3 }
  0x44   : > { %p771_p2 = pnand %p770_p9, %p764_p11 }
  0x46   : > { %774 = shalt.err (!%p771_p2)
}
  0x47   : > { %670 = dma.hbm_to_vmem [thread:$0]  (!%p972_p13), %s979_s25, 384, %s981_s4, %s149_s5  }
  0x48   : > { %p1102_p5 = scmp.ne.s32.totalorder %s1097_s20, 0 }
  0x49   : > { %s1011_s26 = sand.u32 (!%p1102_p5), 1, %s837_s13   ;;  %p1103_p0 = scmp.ne.s32.totalorder (!%p1102_p5), %s1095_s18, 0 }
  0x4a   : > { %169 = sbr.rel (%p1102_p5) target bundleno = 355 (0x163), region = 32  ;;  %s172_s6 = scalar_lea.sflag (!%p1102_p5), [#allocation3], %s1011_s26 }
  0x4b   : > { %s654_s30 = smul.u32 (!%p1102_p5), 24, %s1011_s26 }
  0x4d   : > { %s1015_s7 = scalar_lea.vmem (!%p1102_p5), [#allocation2], %s654_s30 }
  0x51   : > { %820 = dma.done.wait (%p1103_p0), %s172_s6, 384  }
  0x52   : > { %822 = vsyncadd (%p1103_p0), %s172_s6, 4294966912  ;;  %p1104_p13 = scmp.eq.s32.totalorder %s896_s16, 0 }
  0x54   : > { %824 = dma.done.wait (%p1104_p13), [#allocation6], 6144   ;;  %p1105_p1 = pmov %p1104_p13 }
  0x55   : > { %v851_v0 = vmov 0.0|0.0   ;;  %vm852_vm0 = vmmov 0   ;;  %v853_v1 = vmov 0.0   ;;  %v221_v2 = vld [vmem:[#allocation5 + $0x80] sm:$0xff]  ;;  %v222_v3 = vld [vmem:[#allocation5 + $0x88] sm:$0xff]  ;;  %v223_v7 = vld [vmem:[#allocation5 + $0x90] sm:$0xff] }
  0x56   : > { %826 = vsyncadd (%p1105_p1), [#allocation6], 4294961152  ;;  %628 = vmatprep.subr.bf16.mxu1 %v851_v0  ;;  %593 = vmatprep.mubr.msk.f32.mxu1 %vm852_vm0, %v853_v1  ;;  %v205_v4 = vld [vmem:[#allocation5] sm:$0xff]  ;;  %v596_v5 = vpack.c.bf16 %v222_v3, %v221_v2  ;;  %v206_v6 = vld [vmem:[#allocation5 + $0x8] sm:$0xff]  ;;  %s503_s18 = sshll.u32 %s1011_s26, 3  ;;  %s506_s25 = sshll.u32 %s896_s16, 7 }
  0x57   : > { %v224_v8 = vld [vmem:[#allocation5 + $0x98] sm:$0xff]  ;;  %v598_v9 = vpack.c.bf16 %v206_v6, %v205_v4  ;;  %v207_v11 = vld [vmem:[#allocation5 + $0x10] sm:$0xff]  ;;  %v237_v13 = vld [vmem:[#allocation5 + $0x100] sm:$0xff]  ;;  %s201_s4 = scalar_lea.vmem [#allocation7], %s503_s18  ;;  %s1044_s10 = scalar_lea.hbm %s1091_s3, %s506_s25 }
  0x58   : > { %v600_v10 = vpack.c.bf16 %v224_v8, %v223_v7  ;;  %v208_v12 = vld [vmem:[#allocation5 + $0x18] sm:$0xff]  ;;  %597 = vmatprep.subr.bf16.mxu0 %v596_v5  ;;  %v238_v14 = vld [vmem:[#allocation5 + $0x108] sm:$0xff]  ;;  %v225_v15 = vld [vmem:[#allocation5 + $0xa0] sm:$0xff]  ;;  %s416_s5 = sshll.u32 %s201_s4, 4  ;;  %s403_s11 = scalar_lea.sflag [#allocation4], %s1011_s26  ;;  %s1046_s5 = int_to_ptr.vmem [resolvable:$true] %s416_s5 }
  0x59   : > { %v226_v16 = vld [vmem:[#allocation5 + $0xa8] sm:$0xff]  ;;  %599 = vmatpush3.bf16.msra.mxu0 %v598_v9  ;;  %v602_v17 = vpack.c.bf16 %v208_v12, %v207_v11  ;;  %v629_v18 = vpack.c.bf16 %v238_v14, %v237_v13  ;;  %v239_v19 = vld [vmem:[#allocation5 + $0x110] sm:$0xff]  ;;  %v209_v21 = vld [vmem:[#allocation5 + $0x20] sm:$0xff]  ;;  %s775_s27 = scalar_lea.vmem %s1046_s5, 128  ;;  %s854_s16 = smov [#allocation7]  }
  0x5a   : > { %601 = vmatprep.subr.bf16.mxu0 %v600_v10  ;;  %v604_v20 = vpack.c.bf16 %v226_v16, %v225_v15  ;;  %v210_v22 = vld [vmem:[#allocation5 + $0x28] sm:$0xff]  ;;  %v240_v23 = vld [vmem:[#allocation5 + $0x118] sm:$0xff]  ;;  %v227_v25 = vld [vmem:[#allocation5 + $0xb0] sm:$0xff]  ;;  %p776_p4 = scmp.ne.s32.totalorder %s1046_s5, %s775_s27  ;;  %s779_s28 = sshll.u32 %s854_s16, 4  ;;  %s780_s28 = int_to_ptr.vmem [resolvable:$false] %s779_s28 }
  0x5b   : > { %630 = vmatpush3.bf16.msra.mxu1 %v629_v18  ;;  %v632_v24 = vpack.c.bf16 %v240_v23, %v239_v19  ;;  %v228_v26 = vld [vmem:[#allocation5 + $0xb8] sm:$0xff]  ;;  %v241_v27 = vld [vmem:[#allocation5 + $0x120] sm:$0xff]  ;;  %v242_v28 = vld [vmem:[#allocation5 + $0x128] sm:$0xff]  ;;  %v606_v29 = vpack.c.bf16 %v210_v22, %v209_v21  ;;  %s781_s29 = scalar_lea.vmem %s780_s28, 256  ;;  %p782_p10 = scmp.lt.s32.totalorder %s1046_s5, %s780_s28 }
  0x5c   : > { %631 = vmatprep.subr.bf16.mxu1 %v851_v0  ;;  %v608_v30 = vpack.c.bf16 %v228_v26, %v227_v25  ;;  %v211_v31 = vld [vmem:[#allocation5 + $0x30] sm:$0xff]  ;;  %v212_v32 = vld [vmem:[#allocation5 + $0x38] sm:$0xff]  ;;  %v635_v33 = vpack.c.bf16 %v242_v28, %v241_v27  ;;  %v229_v34 = vld [vmem:[#allocation5 + $0xc0] sm:$0xff]  ;;  %p777_p6 = pnand %p776_p4, %p966_p12  ;;  %p783_p11 = scmp.lt.s32.totalorder %s781_s29, %s775_s27 }
  0x5d   : > { %603 = vmatpush3.bf16.msra.mxu0 %v602_v17  ;;  %v230_v35 = vld [vmem:[#allocation5 + $0xc8] sm:$0xff]  ;;  %v243_v36 = vld [vmem:[#allocation5 + $0x130] sm:$0xff]  ;;  %v244_v37 = vld [vmem:[#allocation5 + $0x138] sm:$0xff]  ;;  %v610_v38 = vpack.c.bf16 %v212_v32, %v211_v31 }
  0x5e   : > { %605 = vmatprep.subr.bf16.mxu0 %v604_v20  ;;  %v612_v39 = vpack.c.bf16 %v230_v35, %v229_v34  ;;  %v213_v40 = vld [vmem:[#allocation5 + $0x40] sm:$0xff]  ;;  %v214_v41 = vld [vmem:[#allocation5 + $0x48] sm:$0xff]  ;;  %v638_v42 = vpack.c.bf16 %v244_v37, %v243_v36  ;;  %v231_v43 = vld [vmem:[#allocation5 + $0xd0] sm:$0xff]  ;;  %p778_p8 = pneg %p777_p6  ;;  %p784_p3 = por %p783_p11, %p782_p10 }
  0x5f   : > { %633 = vmatpush3.bf16.msra.mxu1 %v632_v24  ;;  %v232_v44 = vld [vmem:[#allocation5 + $0xd8] sm:$0xff]  ;;  %v245_v45 = vld [vmem:[#allocation5 + $0x140] sm:$0xff]  ;;  %v246_v46 = vld [vmem:[#allocation5 + $0x148] sm:$0xff]  ;;  %v614_v48 = vpack.c.bf16 %v214_v41, %v213_v40 }
  0x60   : > { %634 = vmatprep.subr.bf16.mxu1 %v851_v0  ;;  %v203_v47 = vld [vmem:[%s1015_s7 + $0x8] sm:$0xff]  ;;  %v616_v49 = vpack.c.bf16 %v232_v44, %v231_v43  ;;  %v641_v52 = vpack.c.bf16 %v246_v46, %v245_v45  ;;  %v233_v53 = vld [vmem:[#allocation5 + $0xe0] sm:$0xff]  ;;  %v234_v54 = vld [vmem:[#allocation5 + $0xe8] sm:$0xff]  ;;  %p785_p7 = pnand %p784_p3, %p778_p8 }
  0x61   : > { %607 = vmatpush3.bf16.msra.mxu0 %v606_v29  ;;  %324 = vmatprep.mubr.f32.mxu0 %v203_v47  ;;  %v215_v50 = vld [vmem:[#allocation5 + $0x50] sm:$0xff]  ;;  %v216_v51 = vld [vmem:[#allocation5 + $0x58] sm:$0xff]  ;;  %v620_v58 = vpack.c.bf16 %v234_v54, %v233_v53  ;;  %v217_v59 = vld [vmem:[#allocation5 + $0x60] sm:$0xff] }
  0x62   : > { %609 = vmatprep.subr.bf16.mxu0 %v608_v30  ;;  %v247_v55 = vld [vmem:[#allocation5 + $0x150] sm:$0xff]  ;;  %v248_v56 = vld [vmem:[#allocation5 + $0x158] sm:$0xff]  ;;  %v618_v57 = vpack.c.bf16 %v216_v51, %v215_v50  ;;  %v218_v60 = vld [vmem:[#allocation5 + $0x68] sm:$0xff] }
  0x63   : > { %636 = vmatpush3.bf16.msra.mxu1 %v635_v33  ;;  %v644_v61 = vpack.c.bf16 %v248_v56, %v247_v55  ;;  %v235_v62 = vld [vmem:[#allocation5 + $0xf0] sm:$0xff]  ;;  %v236_v63 = vld [vmem:[#allocation5 + $0xf8] sm:$0xff]  ;;  %v249_v1 = vld [vmem:[#allocation5 + $0x160] sm:$0xff]  ;;  %v622_v3 = vpack.c.bf16 %v218_v60, %v217_v59 }
  0x64   : > { %637 = vmatprep.subr.bf16.mxu1 %v851_v0  ;;  %v250_v2 = vld [vmem:[#allocation5 + $0x168] sm:$0xff]  ;;  %v624_v4 = vpack.c.bf16 %v236_v63, %v235_v62  ;;  %v219_v5 = vld [vmem:[#allocation5 + $0x70] sm:$0xff]  ;;  %v220_v6 = vld [vmem:[#allocation5 + $0x78] sm:$0xff] }
  0x65   : > { %611 = vmatpush3.bf16.msra.mxu0 %v610_v38  ;;  %v647_v7 = vpack.c.bf16 %v250_v2, %v249_v1  ;;  %v251_v8 = vld [vmem:[#allocation5 + $0x170] sm:$0xff]  ;;  %v252_v9 = vld [vmem:[#allocation5 + $0x178] sm:$0xff]  ;;  %v626_v10 = vpack.c.bf16 %v220_v6, %v219_v5 }
  0x66   : > { %613 = vmatprep.subr.bf16.mxu0 %v612_v39  ;;  %v650_v11 = vpack.c.bf16 %v252_v9, %v251_v8  ;;  %v202_v12 = vld [vmem:[%s1015_s7] sm:$0xff]  ;;  %v204_v13 = vld [vmem:[%s1015_s7 + $0x10] sm:$0xff] }
  0x67   : > { %639 = vmatpush3.bf16.msra.mxu1 %v638_v42  ;;  %v504_v16 = vld [vmem:[%s1090_s2] ss:$0 sm:$0xff] }
  0x68   : > { %640 = vmatprep.subr.bf16.mxu1 %v851_v0 }
  0x69   : > { %615 = vmatpush3.bf16.msra.mxu0 %v614_v48 }
  0x6a   : > { %617 = vmatprep.subr.bf16.mxu0 %v616_v49 }
  0x6b   : > { %642 = vmatpush3.bf16.msra.mxu1 %v641_v52 }
  0x6c   : > { %643 = vmatprep.subr.bf16.mxu1 %v851_v0 }
  0x6d   : > { %619 = vmatpush3.bf16.msra.mxu0 %v618_v57 }
  0x6e   : > { %621 = vmatprep.subr.bf16.mxu0 %v620_v58 }
  0x6f   : > { %645 = vmatpush3.bf16.msra.mxu1 %v644_v61 }
  0x70   : > { %646 = vmatprep.subr.bf16.mxu1 %v851_v0 }
  0x71   : > { %623 = vmatpush3.bf16.msra.mxu0 %v622_v3 }
  0x72   : > { %625 = vmatprep.subr.bf16.mxu0 %v624_v4 }
  0x73   : > { %648 = vmatpush3.bf16.msra.mxu1 %v647_v7 }
  0x74   : > { %649 = vmatprep.subr.bf16.mxu1 %v851_v0 }
  0x75   : > { %627 = vmatpush3.bf16.msra.mxu0 %v626_v10 }
  0x77   : > { %651 = vmatpush3.bf16.msra.mxu1 %v650_v11 }
  0x78   : > { %325 = vmatmul.mubr.f32.vlgmr.msra.gmra.mrb[0].mxu0 %v202_v12 }
  0x7a   : > { %594 = vmatmul.mubr.f32.vlgmr.msra.gmra.mrb[0].mxu1 %v204_v13 }
 0x14b   : > { %v541_v14 = vpop.f32.mrb[0].mxu0 }
 0x14c   : > { %v542_v15 = vpop.f32.mrb[1].mxu0 }
 0x14d   : > { %v543_v17 = vadd.f32 %v542_v15, %v541_v14  ;;  %v396_v18 = vpop.f32.mrb[0].mxu1 }
 0x14e   : > { %v595_v19 = vpop.f32.mrb[1].mxu1 }
 0x14f   : > { %v327_v20 = vadd.f32 %v543_v17, %v504_v16 }
 0x151   : > { %v397_v0 = vadd.f32 %v396_v18, %v327_v20 }
 0x153   : > { %v400_v21 = vmax.f32 %v397_v0, 0.0 }
 0x155   : > { %401 = vst [vmem:[%s201_s4] sm:$0xff] %v400_v21 }
 0x156   : > { %788 = shalt.err (!%p785_p7)
}
 0x157   : > { %s789_s22 = scalar_lea.hbm %s1044_s10, 128  ;;  %s793_s6 = scalar_lea.hbm %s1091_s3, 256 }
 0x158   : > { %p790_p9 = scmp.ne.s32.totalorder %s1044_s10, %s789_s22  ;;  %p794_p0 = scmp.lt.u32.totalorder %s1044_s10, %s1091_s3 }
 0x159   : > { %p795_p13 = scmp.lt.u32.totalorder %s793_s6, %s789_s22  ;;  %p797_p4 = scmp.lt.u32.totalorder %s789_s22, %s1044_s10 }
 0x15a   : > { %p791_p2 = pnand %p790_p9, %p966_p12 }
 0x15b   : > { %p796_p1 = por %p795_p13, %p794_p0 }
 0x15c   : > { %p792_p5 = pneg %p791_p2 }
 0x15d   : > { %p798_p6 = por %p797_p4, %p796_p1 }
 0x15f   : > { %p799_p8 = pnand %p798_p6, %p792_p5 }
 0x161   : > { %802 = shalt.err (!%p799_p8)
}
 0x162   : > { %661 = dma.vmem_to_hbm [thread:$0]  (%p966_p12), %s1046_s5, 128, %s1044_s10, %s403_s11  }
 0x163 PF: > { %s428_s20 = sand.u32 1, %s833_s12   ;;  %p1106_p10 = scmp.ne.s32.totalorder %s1096_s19, 0 }
 0x164   : > { %p1107_p11 = scmp.ge.s32.totalorder %s845_s15, 2  ;;  %s429_s23 = scalar_lea.sflag [#allocation4], %s428_s20 }
 0x166   : > { %p672_p3 = pnand %p1107_p11, %p1106_p10 }
 0x168   : > { %828 = dma.done.wait (!%p672_p3), %s429_s23, 128  }
 0x169   : > { %830 = vsyncadd (!%p672_p3), %s429_s23, 4294967168  ;;  %p17_p7 = scmp.ge.s32.totalorder %s931_s24, 4   ;;  %s1108_s12 = smov %s837_s13 }
 0x16a   : > { %s1109_s13 = smov %s841_s14  ;;  %s1110_s14 = smov %s962_s17 }
 0x16b   : > { %s1111_s15 = smov %s931_s24  ;;  %19 = sbr.rel (!%p17_p7) target bundleno = 6 (0x6), region = 81 }
 0x172   :  { %434 = vsyncpa [#allocation3], 1 }
 0x173   :  { %436 = vsyncpa [#allocation3 + $0x1], 1 }
 0x174   :  { %437 = vsyncpa [#allocation6], 1 }
 0x175   :  { %438 = vsyncpa [#allocation4], 1 }
 0x176   :  { %440 = vsyncpa [#allocation4 + $0x1], 1 }

</bundles_post_ra>
